<compile_context>
chip_gen: v7x
topology: tpu7x:2x2x1
jax: 0.10.0
libtpu: 0.0.40
codegen_flags: <defaults>
</compile_context>

<pallas_src>
import functools

import jax
import jax.numpy as jnp
from jax.experimental import pallas as pl
from jax.experimental.pallas import tpu as pltpu

LANE = 128


def _round_up(x, m):
    return -(-x // m) * m


def _pad_c(c):
    return _round_up(c, LANE)


def _default_vmem_limit():
    """~100 MiB on v5e/v6e (128 MiB physical), 48 MiB on v7x (64 MiB)."""
    try:
        cap = getattr(pltpu.get_tpu_info(), "vmem_capacity_bytes", None)
        if cap:
            return int(min(cap - 16 * 1024 * 1024, 100 * 1024 * 1024))
    except Exception:
        pass
    return 48 * 1024 * 1024


_VMEM_LIMIT = _default_vmem_limit()
_COMPILER_PARAMS = pltpu.CompilerParams(
    dimension_semantics=("parallel", "parallel"),
    vmem_limit_bytes=_VMEM_LIMIT,
)


# ----------------------------------------------------------------------------
# Pallas kernels
# ----------------------------------------------------------------------------
def _mm_kernel(p_ref, w_ref, b_ref, o_ref, *, relu):
    """Full-K matmul tile + folded-BN shift (+ReLU)."""
    acc = jnp.dot(p_ref[...], w_ref[...], preferred_element_type=jnp.float32)
    acc = acc + b_ref[...]
    if relu:
        acc = jnp.maximum(acc, 0.0)
    o_ref[...] = acc.astype(o_ref.dtype)


def _mm_res_kernel(p_ref, w_ref, b_ref, r_ref, o_ref, *, relu):
    """Full-K matmul tile + folded-BN shift + fused residual add (+ReLU)."""
    acc = jnp.dot(p_ref[...], w_ref[...], preferred_element_type=jnp.float32)
    acc = acc + b_ref[...] + r_ref[...].astype(jnp.float32)
    if relu:
        acc = jnp.maximum(acc, 0.0)
    o_ref[...] = acc.astype(o_ref.dtype)


def _conv_tap_kernel(*refs, n_views, taps, c, wo, relu):
    """Direct 3x3 conv: accumulate the 9 taps on the MXU for one output row.

    refs = [row_view_0 .. row_view_{n_views-1}, w_ref, b_ref, o_ref].
    taps[t] = (view_index, column_offset) for tap t in (di-major, dj-minor)
    order, matching the weight row packing ((di*3+dj)*C + c).
    """
    view_refs = refs[:n_views]
    w_ref, b_ref, o_ref = refs[n_views], refs[n_views + 1], refs[n_views + 2]
    n = o_ref.shape[0]
    tn = o_ref.shape[3]
    rows = [view_refs[v][...].reshape(n, view_refs[v].shape[2], c)
            for v in range(n_views)]
    acc = jnp.zeros((n * wo, tn), jnp.float32)
    for t, (v, co) in enumerate(taps):
        xw = rows[v][:, co:co + wo, :].reshape(n * wo, c)
        wt = w_ref[t * c:(t + 1) * c, :]
        acc = acc + jnp.dot(xw, wt, preferred_element_type=jnp.float32)
    acc = acc + b_ref[...]
    if relu:
        acc = jnp.maximum(acc, 0.0)
    o_ref[...] = acc.astype(o_ref.dtype).reshape(n, 1, wo, tn)


# ----------------------------------------------------------------------------
# Full-K tiled matmul wrapper (1x1 convs, 7x7 conv1, fallback path)
# ----------------------------------------------------------------------------
def _pick_tm(mp, cap=512):
    """Largest multiple-of-8 tile <= cap that divides mp (avoids M padding)."""
    for t in range(min(cap, mp), 7, -8):
        if mp % t == 0:
            return t
    return 8


def _matmul_bias(patches, w_mat, shift, *, relu, residual=None):
    """out[M, N] = act((patches @ w_mat) + shift (+ residual)).

    Single-shot full-K matmul (K <= 2048 everywhere in this net): no K grid
    axis, no accumulator revisits; double-buffered (TM,K)+(K,TN) bf16 tiles
    stay far below every generation's VMEM budget.
    """
    m, k = patches.shape
    kp, n_out = w_mat.shape                      # kp, n_out multiples of 128
    mp = _round_up(m, 8)
    tm = _pick_tm(mp)
    tn = min(512, n_out)
    # Keep >= 2 output tiles where possible so v7x's two TensorCores get work.
    if (mp // tm) * (n_out // tn) < 2 and tn > 128:
        tn //= 2

    if mp != m or kp != k:
        patches = jnp.pad(patches, ((0, mp - m), (0, kp - k)))
    if residual is not None and mp != m:
        residual = jnp.pad(residual, ((0, mp - m), (0, 0)))

    grid = (mp // tm, n_out // tn)
    in_specs = [
        pl.BlockSpec((tm, kp), lambda i, j: (i, 0)),
        pl.BlockSpec((kp, tn), lambda i, j: (0, j)),
        pl.BlockSpec((1, tn), lambda i, j: (0, j)),
    ]
    args = [patches, w_mat, shift]
    if residual is not None:
        in_specs.append(pl.BlockSpec((tm, tn), lambda i, j: (i, j)))
        args.append(residual)
        kernel = functools.partial(_mm_res_kernel, relu=relu)
    else:
        kernel = functools.partial(_mm_kernel, relu=relu)

    out = pl.pallas_call(
        kernel,
        out_shape=jax.ShapeDtypeStruct((mp, n_out), jnp.bfloat16),
        grid=grid,
        in_specs=in_specs,
        out_specs=pl.BlockSpec((tm, tn), lambda i, j: (i, j)),
        compiler_params=_COMPILER_PARAMS,
    )(*args)
    return out[:m] if mp != m else out


# ----------------------------------------------------------------------------
# Direct 3x3 convolution (no materialized im2col)
# ----------------------------------------------------------------------------
def _build_tap_views(xpad, kh, kw, stride):
    """Decompose a KxK/stride-s conv into contiguous per-tap row windows.

    Returns (views, taps): `views` = list of (array, row_offset) where array
    is the padded input (stride 1) or one of its stride-parity splits
    (stride 2); `taps[t] = (view_index, col_offset)`.
    """
    views, keymap, taps = [], {}, []
    for di in range(kh):
        for dj in range(kw):
            pi, qi = di % stride, di // stride
            pj, qj = dj % stride, dj // stride
            key = (pi, pj, qi)
            if key not in keymap:
                arr = xpad if stride == 1 else xpad[:, pi::stride, pj::stride, :]
                keymap[key] = len(views)
                views.append((arr, qi))
            taps.append((keymap[key], qj))
    return views, taps


def _conv3x3_direct(x, cb, *, stride, relu):
    """3x3 conv + folded BN (+ReLU), one output row per grid step."""
    n, h, w, c = x.shape
    ho = (h + 2 - 3) // stride + 1
    wo = (w + 2 - 3) // stride + 1
    cout_p = cb['w_mat'].shape[1]
    assert cb['w_mat'].shape[0] == 9 * c, (cb['w_mat'].shape, c)

    xpad = jnp.pad(x, ((0, 0), (1, 1), (1, 1), (0, 0)))
    views, taps = _build_tap_views(xpad, 3, 3, stride)

    tn = min(512, cout_p)
    while cout_p % tn:
        tn -= 128
    grid = (cout_p // tn, ho)           # row axis innermost -> weight block
                                        # index constant -> fetched once per j

    in_specs, args = [], []
    for arr, roff in views:
        wv = arr.shape[2]
        in_specs.append(
            pl.BlockSpec((n, 1, wv, c), lambda j, r, o=roff: (0, r + o, 0, 0)))
        args.append(arr)
    in_specs += [pl.BlockSpec((9 * c, tn), lambda j, r: (0, j)),
                 pl.BlockSpec((1, tn), lambda j, r: (0, j))]
    args += [cb['w_mat'], cb['shift']]

    kernel = functools.partial(_conv_tap_kernel, n_views=len(views),
                               taps=tuple(taps), c=c, wo=wo, relu=relu)
    return pl.pallas_call(
        kernel,
        out_shape=jax.ShapeDtypeStruct((n, ho, wo, cout_p), jnp.bfloat16),
        grid=grid,
        in_specs=in_specs,
        out_specs=pl.BlockSpec((n, 1, wo, tn), lambda j, r: (0, r, 0, j)),
        compiler_params=_COMPILER_PARAMS,
    )(*args)


# ----------------------------------------------------------------------------
# Convolution glue (im2col only for 7x7 conv1 / 1x1 reshapes) + maxpool
# ----------------------------------------------------------------------------
def _im2col(x, kh, kw, stride, pad):
    """x: (N,H,W,C) bf16 -> patches (N*Ho*Wo, kh*kw*C), (i,j,c) minor order."""
    n, h, w, c = x.shape
    if kh == 1 and kw == 1 and pad == 0:
        if stride > 1:
            x = x[:, ::stride, ::stride, :]
        ho, wo = x.shape[1], x.shape[2]
        return x.reshape(n * ho * wo, c), ho, wo
    if pad > 0:
        x = jnp.pad(x, ((0, 0), (pad, pad), (pad, pad), (0, 0)))
    ho = (h + 2 * pad - kh) // stride + 1
    wo = (w + 2 * pad - kw) // stride + 1
    cols = []
    for i in range(kh):
        for j in range(kw):
            cols.append(x[:, i:i + stride * ho:stride,
                          j:j + stride * wo:stride, :])
    p = jnp.stack(cols, axis=3)                  # (N, Ho, Wo, kh*kw, C)
    return p.reshape(n * ho * wo, kh * kw * c), ho, wo


def conv_bn(x, cb, *, stride, pad, relu, residual=None):
    """Conv2d (no bias) + folded BN (+ residual) (+ ReLU), NHWC bf16 in/out."""
    kh, kw = cb['kh'], cb['kw']
    if kh == 3 and kw == 3 and pad == 1 and stride in (1, 2) and residual is None:
        try:
            return _conv3x3_direct(x, cb, stride=stride, relu=relu)
        except Exception as e:  # safety net: fall back to im2col path
            print("direct-conv fallback to im2col:", type(e).__name__)
    # TODO(synk): conv1 (7x7) keeps the im2col path; its K=147->256 zero
    # padding wastes some MXU cycles but is a small fraction of total FLOPs.
    n = x.shape[0]
    patches, ho, wo = _im2col(x, kh, kw, stride, pad)
    res2d = None
    if residual is not None:
        res2d = residual.reshape(n * ho * wo, residual.shape[-1])
    out = _matmul_bias(patches, cb['w_mat'], cb['shift'], relu=relu,
                       residual=res2d)
    return out.reshape(n, ho, wo, out.shape[-1])


def maxpool_3x3_s2_p1(x):
    """3x3 / stride 2 / pad 1 max-pool as a fused running maximum (XLA)."""
    n, h, w, c = x.shape
    xp = jnp.pad(x, ((0, 0), (1, 1), (1, 1), (0, 0)),
                 constant_values=-jnp.inf)
    ho = (h + 2 - 3) // 2 + 1
    wo = (w + 2 - 3) // 2 + 1
    out = None
    for i in range(3):
        for j in range(3):
            win = xp[:, i:i + 2 * ho:2, j:j + 2 * wo:2, :]
            out = win if out is None else jnp.maximum(out, win)
    return out


# ----------------------------------------------------------------------------
# Deterministic synthetic ResNet-50 parameters (folded BN, lane-dense layout)
# ----------------------------------------------------------------------------
class KeyGen:
    def __init__(self, seed=0):
        self.key = jax.random.PRNGKey(seed)

    def __call__(self):
        self.key, k = jax.random.split(self.key)
        return k


def make_conv_bn(kg, cout, cin, c_act, kh, kw):
    """Conv weight with the folded-BN scale baked in + f32 shift vector.

    c_act = channel count of the (channel-padded) activation this conv sees.
    Output channels padded to a multiple of 128, K rows to a multiple of 128;
    padded rows/columns are exact zeros so padded channels stay exactly zero.
    """
    fan_in = cin * kh * kw
    w = (jax.random.normal(kg(), (cout, cin, kh, kw), jnp.float32)
         * (1.0 / jnp.sqrt(fan_in)))
    gamma = jax.random.uniform(kg(), (cout,), jnp.float32, 0.8, 1.2)
    beta = jax.random.normal(kg(), (cout,), jnp.float32) * 0.05
    mean = jax.random.normal(kg(), (cout,), jnp.float32) * 0.05
    var = jax.random.uniform(kg(), (cout,), jnp.float32, 0.9, 1.1)
    scale = gamma / jnp.sqrt(var + 1e-5)
    shift = beta - mean * scale

    n_pad = _pad_c(cout)
    w_t = jnp.transpose(w, (2, 3, 1, 0)) * scale[None, None, None, :]  # fold BN
    w_full = jnp.zeros((kh, kw, c_act, n_pad), jnp.float32)
    w_full = w_full.at[:, :, :cin, :cout].set(w_t)
    k_rows = kh * kw * c_act
    w_mat = w_full.reshape(k_rows, n_pad)
    k_pad = _round_up(k_rows, LANE)
    if k_pad != k_rows:
        w_mat = jnp.pad(w_mat, ((0, k_pad - k_rows), (0, 0)))
    b_full = jnp.zeros((1, n_pad), jnp.float32).at[0, :cout].set(shift)
    return {'w_mat': w_mat.astype(jnp.bfloat16), 'shift': b_full,
            'kh': kh, 'kw': kw}


def init_params(kg):
    params = {'conv1': make_conv_bn(kg, 64, 3, 3, 7, 7)}
    inplanes = 64
    cfg = [('layer1', 64, 3, 1), ('layer2', 128, 4, 2),
           ('layer3', 256, 6, 2), ('layer4', 512, 3, 2)]
    for name, planes, nblocks, stride in cfg:
        blocks = []
        for b in range(nblocks):
            s = stride if b == 0 else 1
            blk = {
                # TODO(synk): layer1's 3x3 convs still see the 64->128
                # channel padding (half the K rows are zero multiplies).
                'conv1': make_conv_bn(kg, planes, inplanes, _pad_c(inplanes),
                                      1, 1),
                'conv2': make_conv_bn(kg, planes, planes, _pad_c(planes),
                                      3, 3),
                'conv3': make_conv_bn(kg, planes * 4, planes, _pad_c(planes),
                                      1, 1),
                'stride': s,
            }
            if b == 0:
                blk['down'] = make_conv_bn(kg, planes * 4, inplanes,
                                           _pad_c(inplanes), 1, 1)
            blocks.append(blk)
            inplanes = planes * 4
        params[name] = blocks
    return params


# ----------------------------------------------------------------------------
# Forward pass (mirrors SharedBackbone.forward)
# ----------------------------------------------------------------------------
def bottleneck(x, blk):
    # TODO(synk): layer3/layer4 bottlenecks could be fused into a single
    # pallas_call keeping the intermediates in VMEM (per the v7x review note).
    s = blk['stride']
    if 'down' in blk:
        identity = conv_bn(x, blk['down'], stride=s, pad=0, relu=False)
    else:
        identity = x
    out = conv_bn(x, blk['conv1'], stride=1, pad=0, relu=True)
    out = conv_bn(out, blk['conv2'], stride=s, pad=1, relu=True)
    # conv3 + BN + residual add + ReLU fused into one kernel epilogue.
    out = conv_bn(out, blk['conv3'], stride=1, pad=0, relu=True,
                  residual=identity)
    return out


def shared_backbone_forward(x_nchw, params):
    # NCHW -> NHWC; bf16 activations for the MXU (epilogues stay f32).
    x = jnp.transpose(x_nchw, (0, 2, 3, 1)).astype(jnp.bfloat16)
    x = conv_bn(x, params['conv1'], stride=2, pad=3, relu=True)
    x = maxpool_3x3_s2_p1(x)
    features = {}
    for name, real_c in (('layer1', 256), ('layer2', 512),
                         ('layer3', 1024), ('layer4', 2048)):
        for blk in params[name]:
            x = bottleneck(x, blk)
        features[name] = jnp.transpose(x[..., :real_c],
                                       (0, 3, 1, 2)).astype(jnp.float32)
    return features


# TODO(synk): pretrained ImageNet checkpoint loading has no in-script
# equivalent; parameters are deterministic synthetic values instead.

if __name__ == "__main__":
    kg = KeyGen(0)
    params = init_params(kg)
    x = jax.random.normal(jax.random.PRNGKey(0), (2, 3, 32, 32), jnp.float32)

    feats = shared_backbone_forward(x, params)
    feats = jax.block_until_ready(feats)

    expected = {'layer1': (2, 256, 8, 8), 'layer2': (2, 512, 4, 4),
                'layer3': (2, 1024, 2, 2), 'layer4': (2, 2048, 1, 1)}
    for k, shp in expected.items():
        assert feats[k].shape == shp, (k, feats[k].shape, shp)
        assert feats[k].dtype == jnp.float32
        assert bool(jnp.isfinite(feats[k]).all())
    print("KERNEL_OK")
</pallas_src>

<mosaic_0001>
module attributes {stable_mosaic.version = 11 : i64} {
  func.func @_mm_kernel(%arg0: i32, %arg1: i32, %arg2: memref<512x256xbf16, #tpu.memory_space<vmem>>, %arg3: memref<256x128xbf16, #tpu.memory_space<vmem>>, %arg4: memref<1x128xf32, #tpu.memory_space<vmem>>, %arg5: memref<512x128xbf16, #tpu.memory_space<vmem>>) attributes {dimension_semantics = [#tpu.dimension_semantics<parallel>, #tpu.dimension_semantics<parallel>], iteration_bounds = array<i64: 1, 1>, scalar_prefetch = 0 : i64, scratch_operands = 0 : i64, tpu.core_type = #tpu.core_type<tc>, window_params = [{transform_indices = @transform_0, window_bounds = array<i64: 512, 256>}, {transform_indices = @transform_1, window_bounds = array<i64: 256, 128>}, {transform_indices = @transform_2, window_bounds = array<i64: 1, 128>}, {transform_indices = @transform_3, window_bounds = array<i64: 512, 128>}]} {
    %c0 = arith.constant 0 : index
    %c0_0 = arith.constant 0 : index
    %0 = vector.load %arg2[%c0, %c0_0] : memref<512x256xbf16, #tpu.memory_space<vmem>>, vector<512x256xbf16>
    %c0_1 = arith.constant 0 : index
    %c0_2 = arith.constant 0 : index
    %1 = vector.load %arg3[%c0_1, %c0_2] : memref<256x128xbf16, #tpu.memory_space<vmem>>, vector<256x128xbf16>
    %cst = arith.constant dense<0.000000e+00> : vector<512x128xf32>
    %2 = tpu.matmul %0, %1, %cst {dimension_numbers = #tpu.dot_dimension_numbers<[1], [0], [0], [1], [0, 0, 1, 1], [], []>} : vector<512x256xbf16>, vector<256x128xbf16>, vector<512x128xf32> -> vector<512x128xf32>
    %c0_3 = arith.constant 0 : index
    %c0_4 = arith.constant 0 : index
    %3 = vector.load %arg4[%c0_3, %c0_4] : memref<1x128xf32, #tpu.memory_space<vmem>>, vector<1x128xf32>
    %4 = vector.broadcast %3 : vector<1x128xf32> to vector<512x128xf32>
    %5 = arith.addf %2, %4 : vector<512x128xf32>
    %cst_5 = arith.constant 0.000000e+00 : f32
    %6 = vector.broadcast %cst_5 : f32 to vector<512x128xf32>
    %7 = arith.maximumf %5, %6 : vector<512x128xf32>
    %8 = arith.truncf %7 : vector<512x128xf32> to vector<512x128xbf16>
    %c0_6 = arith.constant 0 : index
    %c0_7 = arith.constant 0 : index
    %9 = vector.load %arg5[%c0_6, %c0_7] : memref<512x128xbf16, #tpu.memory_space<vmem>>, vector<512x128xbf16>
    tpu.vector_store %arg5[%c0_6, %c0_7], %8 {strides = array<i32>} : memref<512x128xbf16, #tpu.memory_space<vmem>>, vector<512x128xbf16>,
    return
  }
  func.func @transform_0(%arg0: i32, %arg1: i32) -> (i32, i32) {
    %c0_i32 = arith.constant 0 : i32
    %c0_i32_0 = arith.constant 0 : i32
    return %arg0, %c0_i32 : i32, i32
  }
  func.func @transform_1(%arg0: i32, %arg1: i32) -> (i32, i32) {
    %c0_i32 = arith.constant 0 : i32
    %c0_i32_0 = arith.constant 0 : i32
    return %c0_i32, %arg1 : i32, i32
  }
  func.func @transform_2(%arg0: i32, %arg1: i32) -> (i32, i32) {
    %c0_i32 = arith.constant 0 : i32
    %c0_i32_0 = arith.constant 0 : i32
    return %c0_i32, %arg1 : i32, i32
  }
  func.func @transform_3(%arg0: i32, %arg1: i32) -> (i32, i32) {
    %c0_i32 = arith.constant 0 : i32
    return %arg0, %arg1 : i32, i32
  }
}

</mosaic_0001>

<bundles_post_ra>
// kernel: tpu_custom_call.1
= control target key start
LH: loop header
LB: loop body
LE: loop exit
PB: predicated region body
PF: predicated region fallthrough
CT: control target
= control target key end

     0   :  { %8 = vsyncpa [#allocation3], 0  ;;  %s2049_s0 = inlined_call_operand.hbm [shape: bf16[512,256], index: 0, kind: input, shape index: {}]   ;;  %s2050_s1 = inlined_call_operand.hbm [shape: bf16[256,128], index: 1, kind: input, shape index: {}]   ;;  %s2051_s2 = inlined_call_operand.vmem [shape: f32[1,128], index: 2, kind: input, shape index: {}]   ;;  %s2052_s3 = inlined_call_operand.hbm [shape: bf16[512,128], index: 3, kind: output, shape index: {}]  }
   0x1   :  { %9 = vsyncpa [#allocation6], 0 }
   0x2   :  { %10 = vsyncpa [#allocation4], 0  ;;  %s1878_s12 = smov [#allocation2]   ;;  %s1806_s16 = scalar_lea.hbm %s2049_s0, 8192 }
   0x3   :  { %s16_s13 = sshll.u32 %s1878_s12, 4  ;;  %p1807_p0 = scmp.ne.s32.totalorder %s2049_s0, %s1806_s16  ;;  %s17_s13 = int_to_ptr.vmem [resolvable:$true] %s16_s13 }
   0x4   :  { %p1810_p1 = scmp.lt.u32.totalorder %s1806_s16, %s2049_s0 }
   0x6   :  { %p1812_p2 = pnand %p1810_p1, %p1807_p0 }
   0x8   :  { %1815 = shalt.err (!%p1812_p2)
}
   0x9   :  { %s1816_s21 = scalar_lea.vmem %s17_s13, 8192  ;;  %p1821_p4 = scmp.lt.s32.totalorder %s17_s13, %s17_s13 }
   0xa   :  { %p1817_p3 = scmp.ne.s32.totalorder %s17_s13, %s1816_s21  ;;  %p1822_p5 = scmp.lt.s32.totalorder %s1816_s21, %s1816_s21 }
   0xc   :  { %p1823_p6 = por %p1822_p5, %p1821_p4 }
   0xe   :  { %p1824_p7 = pnand %p1823_p6, %p1817_p3 }
  0x10   :  { %1827 = shalt.err (!%p1824_p7)
}
  0x11   :  { %s1879_s22 = smov 128   ;;  %s1880_s23 = smov 8  }
  0x12   :  { %22 = dma.hbm_to_vmem [thread:$0]  %s2049_s0, 8192, %s17_s13, [#allocation3], %s1879_s22, %s1879_s22, %s1880_s23  }
  0x13   :  { %s1881_s26 = smov [#allocation5]   ;;  %s1828_s30 = scalar_lea.hbm %s2050_s1, 2048 }
  0x14   :  { %s28_s27 = sshll.u32 %s1881_s26, 4  ;;  %p1829_p8 = scmp.ne.s32.totalorder %s2050_s1, %s1828_s30  ;;  %s29_s27 = int_to_ptr.vmem [resolvable:$true] %s28_s27 }
  0x15   :  { %p1832_p9 = scmp.lt.u32.totalorder %s1828_s30, %s2050_s1 }
  0x17   :  { %p1834_p10 = pnand %p1832_p9, %p1829_p8 }
  0x19   :  { %1837 = shalt.err (!%p1834_p10)
}
  0x1a   :  { %s1838_s8 = scalar_lea.vmem %s29_s27, 2048  ;;  %p1843_p12 = scmp.lt.s32.totalorder %s29_s27, %s29_s27 }
  0x1b   :  { %p1839_p11 = scmp.ne.s32.totalorder %s29_s27, %s1838_s8  ;;  %p1844_p13 = scmp.lt.s32.totalorder %s1838_s8, %s1838_s8 }
  0x1d   :  { %p1845_p0 = por %p1844_p13, %p1843_p12 }
  0x1f   :  { %p1846_p1 = pnand %p1845_p0, %p1839_p11 }
  0x21   :  { %1849 = shalt.err (!%p1846_p1)
}
  0x22   :  { %s1882_s0 = smov 64   ;;  %s1883_s9 = smov 4  }
  0x23   :  { %34 = dma.hbm_to_vmem [thread:$0]  %s2050_s1, 2048, %s29_s27, [#allocation6], %s1882_s0, %s1882_s0, %s1883_s9  }
  0x24   :  { %1872 = dma.done.wait [#allocation3], 8192  }
  0x25   :  { %1873 = vsyncadd [#allocation3], 4294959104 }
  0x26   :  { %1874 = dma.done.wait [#allocation6], 2048  }
  0x27   :  { %1875 = vsyncadd [#allocation6], 4294965248  ;;  %v1884_v0 = vmov 0   ;;  %v1694_v1 = vld [vmem:[#allocation5] sm:$0xff]   ;;  %v1695_v2 = vld [vmem:[#allocation5 + $0x8] sm:$0xff]  }
  0x28   :  { %563 = vmatprep.subr.bf16.mxu0 %v1884_v0  ;;  %1654 = vmatprep.subr.bf16.mxu1 %v1884_v0  ;;  %v1696_v3 = vld [vmem:[#allocation5 + $0x10] sm:$0xff]   ;;  %v1697_v4 = vld [vmem:[#allocation5 + $0x18] sm:$0xff]   ;;  %v1698_v5 = vld [vmem:[#allocation5 + $0x20] sm:$0xff]  }
  0x29   :  { %564 = vmatpush1.bf16.msra.mxu0 %v1694_v1  ;;  %1670 = vmatpush1.bf16.msra.mxu1 %v1694_v1  ;;  %v1712_v6 = vld [vmem:[#allocation2 + $0x4] ss:$8 sps:$4 sm:$0xff]   ;;  %v1700_v9 = vld [vmem:[#allocation5 + $0x30] sm:$0xff]   ;;  %v1701_v10 = vld [vmem:[#allocation5 + $0x38] sm:$0xff]  }
  0x2a   :  { %565 = vmatprep.subr.bf16.mxu0 %v1884_v0  ;;  %1655 = vmatprep.subr.bf16.mxu1 %v1884_v0  ;;  %v1699_v7 = vld [vmem:[#allocation5 + $0x28] sm:$0xff]   ;;  %v1702_v11 = vld [vmem:[#allocation5 + $0x40] sm:$0xff]   ;;  %v1704_v13 = vld [vmem:[#allocation5 + $0x50] sm:$0xff]  }
  0x2b   :  { %v1715_v8 = vld [vmem:[#allocation2 + $0x104] ss:$8 sps:$4 sm:$0xff]   ;;  %595 = vmatprep.mubr.bf16.mxu0 %v1712_v6  ;;  %v1705_v14 = vld [vmem:[#allocation5 + $0x58] sm:$0xff]   ;;  %v1708_v17 = vld [vmem:[#allocation5 + $0x70] sm:$0xff]  }
  0x2c   :  { %723 = vmatprep.mubr.bf16.mxu1 %v1715_v8  ;;  %v1703_v12 = vld [vmem:[#allocation5 + $0x48] sm:$0xff]   ;;  %v1706_v15 = vld [vmem:[#allocation5 + $0x60] sm:$0xff]   ;;  %v1709_v18 = vld [vmem:[#allocation5 + $0x78] sm:$0xff]  }
  0x2d   :  { %566 = vmatpush1.bf16.msra.mxu0 %v1695_v2  ;;  %1671 = vmatpush1.bf16.msra.mxu1 %v1695_v2  ;;  %v1707_v16 = vld [vmem:[#allocation5 + $0x68] sm:$0xff]   ;;  %v1716_v21 = vld [vmem:[#allocation2 + $0x14] ss:$8 sps:$4 sm:$0xff]   ;;  %v1720_v23 = vld [vmem:[#allocation2 + $0x10] ss:$8 sps:$4 sm:$0xff]  }
  0x2e   :  { %567 = vmatprep.subr.bf16.mxu0 %v1884_v0  ;;  %1656 = vmatprep.subr.bf16.mxu1 %v1884_v0  ;;  %v1710_v19 = vld [vmem:[#allocation2] ss:$8 sps:$4 sm:$0xff]   ;;  %v1718_v22 = vld [vmem:[#allocation2 + $0x114] ss:$8 sps:$4 sm:$0xff]   ;;  %v1721_v24 = vld [vmem:[#allocation2 + $0x110] ss:$8 sps:$4 sm:$0xff]  }
  0x2f   :  { %v1713_v20 = vld [vmem:[#allocation2 + $0x100] ss:$8 sps:$4 sm:$0xff]   ;;  %v1722_v25 = vld [vmem:[#allocation2 + $0x24] ss:$8 sps:$4 sm:$0xff]   ;;  %v1728_v29 = vld [vmem:[#allocation2 + $0x34] ss:$8 sps:$4 sm:$0xff]  }
  0x30   :  { %v1724_v26 = vld [vmem:[#allocation2 + $0x124] ss:$8 sps:$4 sm:$0xff]   ;;  %v1726_v27 = vld [vmem:[#allocation2 + $0x20] ss:$8 sps:$4 sm:$0xff]   ;;  %v1730_v30 = vld [vmem:[#allocation2 + $0x134] ss:$8 sps:$4 sm:$0xff]  }
  0x31   :  { %568 = vmatpush1.bf16.msra.mxu0 %v1696_v3  ;;  %1672 = vmatpush1.bf16.msra.mxu1 %v1696_v3  ;;  %v1727_v28 = vld [vmem:[#allocation2 + $0x120] ss:$8 sps:$4 sm:$0xff]   ;;  %v1732_v31 = vld [vmem:[#allocation2 + $0x30] ss:$8 sps:$4 sm:$0xff]   ;;  %v1734_v33 = vld [vmem:[#allocation2 + $0x44] ss:$8 sps:$4 sm:$0xff]  }
  0x32   :  { %569 = vmatprep.subr.bf16.mxu0 %v1884_v0  ;;  %1657 = vmatprep.subr.bf16.mxu1 %v1884_v0  ;;  %v1733_v32 = vld [vmem:[#allocation2 + $0x130] ss:$8 sps:$4 sm:$0xff]   ;;  %v1736_v34 = vld [vmem:[#allocation2 + $0x144] ss:$8 sps:$4 sm:$0xff]   ;;  %v1738_v35 = vld [vmem:[#allocation2 + $0x40] ss:$8 sps:$4 sm:$0xff]  }
  0x33   :  { %v1739_v36 = vld [vmem:[#allocation2 + $0x140] ss:$8 sps:$4 sm:$0xff]   ;;  %v1740_v37 = vld [vmem:[#allocation2 + $0x54] ss:$8 sps:$4 sm:$0xff]   ;;  %v1744_v39 = vld [vmem:[#allocation2 + $0x50] ss:$8 sps:$4 sm:$0xff]  }
  0x34   :  { %v1742_v38 = vld [vmem:[#allocation2 + $0x154] ss:$8 sps:$4 sm:$0xff]   ;;  %v1745_v40 = vld [vmem:[#allocation2 + $0x150] ss:$8 sps:$4 sm:$0xff]   ;;  %v1746_v41 = vld [vmem:[#allocation2 + $0x64] ss:$8 sps:$4 sm:$0xff]  }
  0x35   :  { %570 = vmatpush1.bf16.msra.mxu0 %v1697_v4  ;;  %1673 = vmatpush1.bf16.msra.mxu1 %v1697_v4  ;;  %v1748_v42 = vld [vmem:[#allocation2 + $0x164] ss:$8 sps:$4 sm:$0xff]   ;;  %v1750_v43 = vld [vmem:[#allocation2 + $0x60] ss:$8 sps:$4 sm:$0xff]   ;;  %v1752_v45 = vld [vmem:[#allocation2 + $0x74] ss:$8 sps:$4 sm:$0xff]  }
  0x36   :  { %571 = vmatprep.subr.bf16.mxu0 %v1884_v0  ;;  %1658 = vmatprep.subr.bf16.mxu1 %v1884_v0  ;;  %v1751_v44 = vld [vmem:[#allocation2 + $0x160] ss:$8 sps:$4 sm:$0xff]   ;;  %v1754_v46 = vld [vmem:[#allocation2 + $0x174] ss:$8 sps:$4 sm:$0xff]   ;;  %v1756_v47 = vld [vmem:[#allocation2 + $0x70] ss:$8 sps:$4 sm:$0xff]  }
  0x37   :  { %v1757_v48 = vld [vmem:[#allocation2 + $0x170] ss:$8 sps:$4 sm:$0xff]   ;;  %v1758_v49 = vld [vmem:[#allocation2 + $0x84] ss:$8 sps:$4 sm:$0xff]   ;;  %v1762_v51 = vld [vmem:[#allocation2 + $0x80] ss:$8 sps:$4 sm:$0xff]  }
  0x38   :  { %v1760_v50 = vld [vmem:[#allocation2 + $0x184] ss:$8 sps:$4 sm:$0xff]   ;;  %v1763_v52 = vld [vmem:[#allocation2 + $0x180] ss:$8 sps:$4 sm:$0xff]   ;;  %v1764_v53 = vld [vmem:[#allocation2 + $0x94] ss:$8 sps:$4 sm:$0xff]  }
  0x39   :  { %572 = vmatpush1.bf16.msra.mxu0 %v1698_v5  ;;  %1674 = vmatpush1.bf16.msra.mxu1 %v1698_v5  ;;  %v1766_v54 = vld [vmem:[#allocation2 + $0x194] ss:$8 sps:$4 sm:$0xff]   ;;  %v1768_v55 = vld [vmem:[#allocation2 + $0x90] ss:$8 sps:$4 sm:$0xff]   ;;  %v1770_v57 = vld [vmem:[#allocation2 + $0xa4] ss:$8 sps:$4 sm:$0xff]  }
  0x3a   :  { %573 = vmatprep.subr.bf16.mxu0 %v1884_v0  ;;  %1659 = vmatprep.subr.bf16.mxu1 %v1884_v0  ;;  %v1769_v56 = vld [vmem:[#allocation2 + $0x190] ss:$8 sps:$4 sm:$0xff]   ;;  %v1772_v58 = vld [vmem:[#allocation2 + $0x1a4] ss:$8 sps:$4 sm:$0xff]   ;;  %v1774_v59 = vld [vmem:[#allocation2 + $0xa0] ss:$8 sps:$4 sm:$0xff]  }
  0x3b   :  { %v1775_v60 = vld [vmem:[#allocation2 + $0x1a0] ss:$8 sps:$4 sm:$0xff]   ;;  %v1776_v61 = vld [vmem:[#allocation2 + $0xb4] ss:$8 sps:$4 sm:$0xff]   ;;  %v1780_v63 = vld [vmem:[#allocation2 + $0xb0] ss:$8 sps:$4 sm:$0xff]  }
  0x3c   :  { %v1778_v62 = vld [vmem:[#allocation2 + $0x1b4] ss:$8 sps:$4 sm:$0xff]   ;;  %v1782_v1 = vld [vmem:[#allocation2 + $0xc4] ss:$8 sps:$4 sm:$0xff]   ;;  %v1786_v3 = vld [vmem:[#allocation2 + $0xc0] ss:$8 sps:$4 sm:$0xff]  }
  0x3d   :  { %574 = vmatpush1.bf16.msra.mxu0 %v1699_v7  ;;  %1675 = vmatpush1.bf16.msra.mxu1 %v1699_v7  ;;  %v1784_v2 = vld [vmem:[#allocation2 + $0x1c4] ss:$8 sps:$4 sm:$0xff]   ;;  %v1787_v4 = vld [vmem:[#allocation2 + $0x1c0] ss:$8 sps:$4 sm:$0xff]   ;;  %v1788_v5 = vld [vmem:[#allocation2 + $0xd4] ss:$8 sps:$4 sm:$0xff]  }
  0x3e   :  { %575 = vmatprep.subr.bf16.mxu0 %v1884_v0  ;;  %1660 = vmatprep.subr.bf16.mxu1 %v1884_v0  ;;  %v1790_v6 = vld [vmem:[#allocation2 + $0x1d4] ss:$8 sps:$4 sm:$0xff]   ;;  %v1792_v7 = vld [vmem:[#allocation2 + $0xd0] ss:$8 sps:$4 sm:$0xff]  }
  0x3f   :  { %v1793_v8 = vld [vmem:[#allocation2 + $0x1d0] ss:$8 sps:$4 sm:$0xff]  }
  0x41   :  { %576 = vmatpush1.bf16.msra.mxu0 %v1700_v9  ;;  %1676 = vmatpush1.bf16.msra.mxu1 %v1700_v9  ;;  %v1794_v9 = vld [vmem:[#allocation2 + $0xe4] ss:$8 sps:$4 sm:$0xff]  }
  0x42   :  { %577 = vmatprep.subr.bf16.mxu0 %v1884_v0  ;;  %1661 = vmatprep.subr.bf16.mxu1 %v1884_v0 }
  0x45   :  { %578 = vmatpush1.bf16.msra.mxu0 %v1701_v10  ;;  %1677 = vmatpush1.bf16.msra.mxu1 %v1701_v10  ;;  %v1796_v10 = vld [vmem:[#allocation2 + $0x1e4] ss:$8 sps:$4 sm:$0xff]  }
  0x46   :  { %579 = vmatprep.subr.bf16.mxu0 %v1884_v0  ;;  %1662 = vmatprep.subr.bf16.mxu1 %v1884_v0 }
  0x49   :  { %580 = vmatpush1.bf16.msra.mxu0 %v1702_v11  ;;  %1678 = vmatpush1.bf16.msra.mxu1 %v1702_v11  ;;  %v1798_v11 = vld [vmem:[#allocation2 + $0xe0] ss:$8 sps:$4 sm:$0xff]  }
  0x4a   :  { %581 = vmatprep.subr.bf16.mxu0 %v1884_v0  ;;  %1663 = vmatprep.subr.bf16.mxu1 %v1884_v0 }
  0x4d   :  { %582 = vmatpush1.bf16.msra.mxu0 %v1703_v12  ;;  %1679 = vmatpush1.bf16.msra.mxu1 %v1703_v12  ;;  %v1799_v12 = vld [vmem:[#allocation2 + $0x1e0] ss:$8 sps:$4 sm:$0xff]  }
  0x4e   :  { %583 = vmatprep.subr.bf16.mxu0 %v1884_v0  ;;  %1664 = vmatprep.subr.bf16.mxu1 %v1884_v0 }
  0x51   :  { %584 = vmatpush1.bf16.msra.mxu0 %v1704_v13  ;;  %1680 = vmatpush1.bf16.msra.mxu1 %v1704_v13  ;;  %v1800_v13 = vld [vmem:[#allocation2 + $0xf4] ss:$8 sps:$4 sm:$0xff]  }
  0x52   :  { %585 = vmatprep.subr.bf16.mxu0 %v1884_v0  ;;  %1665 = vmatprep.subr.bf16.mxu1 %v1884_v0 }
  0x55   :  { %586 = vmatpush1.bf16.msra.mxu0 %v1705_v14  ;;  %1681 = vmatpush1.bf16.msra.mxu1 %v1705_v14  ;;  %v1802_v14 = vld [vmem:[#allocation2 + $0x1f4] ss:$8 sps:$4 sm:$0xff]  }
  0x56   :  { %587 = vmatprep.subr.bf16.mxu0 %v1884_v0  ;;  %1666 = vmatprep.subr.bf16.mxu1 %v1884_v0 }
  0x59   :  { %588 = vmatpush1.bf16.msra.mxu0 %v1706_v15  ;;  %1682 = vmatpush1.bf16.msra.mxu1 %v1706_v15  ;;  %v1804_v15 = vld [vmem:[#allocation2 + $0xf0] ss:$8 sps:$4 sm:$0xff]  }
  0x5a   :  { %589 = vmatprep.subr.bf16.mxu0 %v1884_v0  ;;  %1667 = vmatprep.subr.bf16.mxu1 %v1884_v0 }
  0x5d   :  { %590 = vmatpush1.bf16.msra.mxu0 %v1707_v16  ;;  %1683 = vmatpush1.bf16.msra.mxu1 %v1707_v16  ;;  %v1805_v16 = vld [vmem:[#allocation2 + $0x1f0] ss:$8 sps:$4 sm:$0xff]  }
  0x5e   :  { %591 = vmatprep.subr.bf16.mxu0 %v1884_v0  ;;  %1668 = vmatprep.subr.bf16.mxu1 %v1884_v0 }
  0x61   :  { %592 = vmatpush1.bf16.msra.mxu0 %v1708_v17  ;;  %1684 = vmatpush1.bf16.msra.mxu1 %v1708_v17  ;;  %v1968_v17 = vld [vmem:[%s2051_s2] ss:$0 sm:$0xff]  ;;  %s1885_s2 = smov [#allocation7]  }
  0x62   :  { %593 = vmatprep.subr.bf16.mxu0 %v1884_v0  ;;  %1669 = vmatprep.subr.bf16.mxu1 %v1884_v0  ;;  %v1781_v0 = vld [vmem:[#allocation2 + $0x1b0] ss:$8 sps:$4 sm:$0xff]   ;;  %s1241_s13 = sshll.u32 %s1885_s2, 4  ;;  %s1242_s13 = int_to_ptr.vmem [resolvable:$true] %s1241_s13 }
  0x63   :  { %s1850_s14 = scalar_lea.vmem %s1242_s13, 4096  ;;  %p1855_p3 = scmp.lt.s32.totalorder %s1242_s13, %s1242_s13 }
  0x64   :  { %p1851_p2 = scmp.ne.s32.totalorder %s1242_s13, %s1850_s14  ;;  %p1856_p4 = scmp.lt.s32.totalorder %s1850_s14, %s1850_s14 }
  0x65   :  { %594 = vmatpush1.bf16.msra.mxu0 %v1709_v18  ;;  %1685 = vmatpush1.bf16.msra.mxu1 %v1709_v18 }
  0x66   :  { %p1857_p5 = por %p1856_p4, %p1855_p3 }
  0x68   :  { %596 = vmatmul.mubr.bf16.vlgmr.msra.gmra.mrb[0].mxu0 %v1710_v19  ;;  %724 = vmatmul.mubr.bf16.vlgmr.msra.gmra.mrb[0].mxu1 %v1713_v20  ;;  %p1858_p6 = pnand %p1857_p5, %p1851_p2 }
  0x69   :  { %603 = vmatprep.mubr.bf16.mxu0 %v1716_v21  ;;  %731 = vmatprep.mubr.bf16.mxu1 %v1718_v22 }
  0x70   :  { %604 = vmatmul.mubr.bf16.gmra.mrb[4].mxu0 %v1720_v23  ;;  %732 = vmatmul.mubr.bf16.gmra.mrb[4].mxu1 %v1721_v24 }
  0x71   :  { %611 = vmatprep.mubr.bf16.mxu0 %v1722_v25  ;;  %739 = vmatprep.mubr.bf16.mxu1 %v1724_v26 }
  0x78   :  { %612 = vmatmul.mubr.bf16.gmra.mrb[8].mxu0 %v1726_v27  ;;  %740 = vmatmul.mubr.bf16.gmra.mrb[8].mxu1 %v1727_v28 }
  0x79   :  { %619 = vmatprep.mubr.bf16.mxu0 %v1728_v29  ;;  %747 = vmatprep.mubr.bf16.mxu1 %v1730_v30 }
  0x80   :  { %620 = vmatmul.mubr.bf16.gmra.mrb[12].mxu0 %v1732_v31  ;;  %748 = vmatmul.mubr.bf16.gmra.mrb[12].mxu1 %v1733_v32 }
  0x81   :  { %627 = vmatprep.mubr.bf16.mxu0 %v1734_v33  ;;  %755 = vmatprep.mubr.bf16.mxu1 %v1736_v34 }
  0x88   :  { %628 = vmatmul.mubr.bf16.gmra.mrb[16].mxu0 %v1738_v35  ;;  %756 = vmatmul.mubr.bf16.gmra.mrb[16].mxu1 %v1739_v36 }
  0x89   :  { %635 = vmatprep.mubr.bf16.mxu0 %v1740_v37  ;;  %763 = vmatprep.mubr.bf16.mxu1 %v1742_v38 }
  0x90   :  { %636 = vmatmul.mubr.bf16.gmra.mrb[20].mxu0 %v1744_v39  ;;  %764 = vmatmul.mubr.bf16.gmra.mrb[20].mxu1 %v1745_v40 }
  0x91   :  { %643 = vmatprep.mubr.bf16.mxu0 %v1746_v41  ;;  %771 = vmatprep.mubr.bf16.mxu1 %v1748_v42 }
  0x98   :  { %644 = vmatmul.mubr.bf16.gmra.mrb[24].mxu0 %v1750_v43  ;;  %772 = vmatmul.mubr.bf16.gmra.mrb[24].mxu1 %v1751_v44 }
  0x99   :  { %651 = vmatprep.mubr.bf16.mxu0 %v1752_v45  ;;  %779 = vmatprep.mubr.bf16.mxu1 %v1754_v46 }
  0xa0   :  { %652 = vmatmul.mubr.bf16.gmra.mrb[28].mxu0 %v1756_v47  ;;  %780 = vmatmul.mubr.bf16.gmra.mrb[28].mxu1 %v1757_v48 }
  0xa1   :  { %659 = vmatprep.mubr.bf16.mxu0 %v1758_v49  ;;  %787 = vmatprep.mubr.bf16.mxu1 %v1760_v50 }
  0xa8   :  { %660 = vmatmul.mubr.bf16.gmra.mrb[32].mxu0 %v1762_v51  ;;  %788 = vmatmul.mubr.bf16.gmra.mrb[32].mxu1 %v1763_v52 }
  0xa9   :  { %667 = vmatprep.mubr.bf16.mxu0 %v1764_v53  ;;  %795 = vmatprep.mubr.bf16.mxu1 %v1766_v54 }
  0xb0   :  { %668 = vmatmul.mubr.bf16.gmra.mrb[36].mxu0 %v1768_v55  ;;  %796 = vmatmul.mubr.bf16.gmra.mrb[36].mxu1 %v1769_v56 }
  0xb1   :  { %675 = vmatprep.mubr.bf16.mxu0 %v1770_v57  ;;  %803 = vmatprep.mubr.bf16.mxu1 %v1772_v58 }
  0xb8   :  { %676 = vmatmul.mubr.bf16.gmra.mrb[40].mxu0 %v1774_v59  ;;  %804 = vmatmul.mubr.bf16.gmra.mrb[40].mxu1 %v1775_v60 }
  0xb9   :  { %683 = vmatprep.mubr.bf16.mxu0 %v1776_v61  ;;  %811 = vmatprep.mubr.bf16.mxu1 %v1778_v62 }
  0xc0   :  { %684 = vmatmul.mubr.bf16.gmra.mrb[44].mxu0 %v1780_v63  ;;  %812 = vmatmul.mubr.bf16.gmra.mrb[44].mxu1 %v1781_v0 }
  0xc1   :  { %691 = vmatprep.mubr.bf16.mxu0 %v1782_v1  ;;  %819 = vmatprep.mubr.bf16.mxu1 %v1784_v2 }
  0xc8   :  { %692 = vmatmul.mubr.bf16.gmra.mrb[48].mxu0 %v1786_v3  ;;  %820 = vmatmul.mubr.bf16.gmra.mrb[48].mxu1 %v1787_v4 }
  0xc9   :  { %699 = vmatprep.mubr.bf16.mxu0 %v1788_v5  ;;  %827 = vmatprep.mubr.bf16.mxu1 %v1790_v6 }
  0xd0   :  { %700 = vmatmul.mubr.bf16.gmra.mrb[52].mxu0 %v1792_v7  ;;  %828 = vmatmul.mubr.bf16.gmra.mrb[52].mxu1 %v1793_v8 }
  0xd1   :  { %707 = vmatprep.mubr.bf16.mxu0 %v1794_v9  ;;  %835 = vmatprep.mubr.bf16.mxu1 %v1796_v10 }
  0xd8   :  { %708 = vmatmul.mubr.bf16.gmra.mrb[56].mxu0 %v1798_v11  ;;  %836 = vmatmul.mubr.bf16.gmra.mrb[56].mxu1 %v1799_v12 }
  0xd9   :  { %715 = vmatprep.mubr.bf16.mxu0 %v1800_v13  ;;  %843 = vmatprep.mubr.bf16.mxu1 %v1802_v14 }
  0xe0   :  { %716 = vmatmul.mubr.bf16.gmra.mrb[60].mxu0 %v1804_v15  ;;  %844 = vmatmul.mubr.bf16.gmra.mrb[60].mxu1 %v1805_v16 }
 0x13b   :  { %v597_v18 = vpop.f32.mrb[0].mxu0  ;;  %v725_v19 = vpop.f32.mrb[0].mxu1 }
 0x13c   :  { %v598_v20 = vadd.f32 %v1968_v17, %v597_v18  ;;  %v726_v21 = vadd.f32 %v1968_v17, %v725_v19  ;;  %v599_v22 = vpop.f32.mrb[1].mxu0  ;;  %v727_v23 = vpop.f32.mrb[1].mxu1 }
 0x13d   :  { %v600_v24 = vpop.f32.mrb[2].mxu0  ;;  %v728_v25 = vpop.f32.mrb[2].mxu1 }
 0x13e   :  { %v601_v26 = vadd.f32 %v1968_v17, %v600_v24  ;;  %v729_v27 = vadd.f32 %v1968_v17, %v728_v25  ;;  %v602_v28 = vpop.f32.mrb[3].mxu0  ;;  %v730_v29 = vpop.f32.mrb[3].mxu1  ;;  %v852_v30 = vmax.f32 %v598_v20, 0.0  ;;  %v884_v31 = vmax.f32 %v726_v21, 0.0 }
 0x140   :  { %v853_v32 = vmax.f32 %v601_v26, 0.0  ;;  %v885_v33 = vmax.f32 %v729_v27, 0.0 }
 0x142   :  { %v1466_v34 = vpack.c.bf16 %v853_v32, %v852_v30  ;;  %v1546_v35 = vpack.c.bf16 %v885_v33, %v884_v31 }
 0x143   :  { %v605_v36 = vpop.f32.mrb[4].mxu0  ;;  %v733_v37 = vpop.f32.mrb[4].mxu1 }
 0x144   :  { %1467 = vst [vmem:[#allocation7] sm:$0xff] %v1466_v34   ;;  %1638 = vst [vmem:[#allocation7 + $0x80] sm:$0xff] %v1546_v35   ;;  %v606_v38 = vadd.f32 %v1968_v17, %v605_v36  ;;  %v734_v39 = vadd.f32 %v1968_v17, %v733_v37  ;;  %v607_v40 = vpop.f32.mrb[5].mxu0  ;;  %v735_v41 = vpop.f32.mrb[5].mxu1 }
 0x145   :  { %v608_v42 = vpop.f32.mrb[6].mxu0  ;;  %v736_v43 = vpop.f32.mrb[6].mxu1 }
 0x146   :  { %v609_v44 = vadd.f32 %v1968_v17, %v608_v42  ;;  %v737_v45 = vadd.f32 %v1968_v17, %v736_v43  ;;  %v610_v46 = vpop.f32.mrb[7].mxu0  ;;  %v738_v47 = vpop.f32.mrb[7].mxu1  ;;  %v854_v48 = vmax.f32 %v606_v38, 0.0  ;;  %v886_v49 = vmax.f32 %v734_v39, 0.0 }
 0x148   :  { %v855_v50 = vmax.f32 %v609_v44, 0.0  ;;  %v887_v51 = vmax.f32 %v737_v45, 0.0 }
 0x14a   :  { %v1471_v52 = vpack.c.bf16 %v855_v50, %v854_v48  ;;  %v1551_v53 = vpack.c.bf16 %v887_v51, %v886_v49 }
 0x14b   :  { %v613_v54 = vpop.f32.mrb[8].mxu0  ;;  %v741_v55 = vpop.f32.mrb[8].mxu1 }
 0x14c   :  { %1623 = vst [vmem:[#allocation7 + $0x8] sm:$0xff] %v1471_v52   ;;  %1639 = vst [vmem:[#allocation7 + $0x88] sm:$0xff] %v1551_v53   ;;  %v614_v56 = vadd.f32 %v1968_v17, %v613_v54  ;;  %v742_v57 = vadd.f32 %v1968_v17, %v741_v55  ;;  %v615_v58 = vpop.f32.mrb[9].mxu0  ;;  %v743_v59 = vpop.f32.mrb[9].mxu1 }
 0x14d   :  { %v616_v60 = vpop.f32.mrb[10].mxu0  ;;  %v744_v61 = vpop.f32.mrb[10].mxu1 }
 0x14e   :  { %v617_v62 = vadd.f32 %v1968_v17, %v616_v60  ;;  %v745_v63 = vadd.f32 %v1968_v17, %v744_v61  ;;  %v618_v0 = vpop.f32.mrb[11].mxu0  ;;  %v746_v1 = vpop.f32.mrb[11].mxu1  ;;  %v856_v2 = vmax.f32 %v614_v56, 0.0  ;;  %v888_v3 = vmax.f32 %v742_v57, 0.0 }
 0x150   :  { %v857_v4 = vmax.f32 %v617_v62, 0.0  ;;  %v889_v5 = vmax.f32 %v745_v63, 0.0 }
 0x152   :  { %v1476_v6 = vpack.c.bf16 %v857_v4, %v856_v2  ;;  %v1556_v7 = vpack.c.bf16 %v889_v5, %v888_v3 }
 0x153   :  { %v621_v8 = vpop.f32.mrb[12].mxu0  ;;  %v749_v9 = vpop.f32.mrb[12].mxu1 }
 0x154   :  { %1624 = vst [vmem:[#allocation7 + $0x10] sm:$0xff] %v1476_v6   ;;  %1640 = vst [vmem:[#allocation7 + $0x90] sm:$0xff] %v1556_v7   ;;  %v622_v10 = vadd.f32 %v1968_v17, %v621_v8  ;;  %v750_v11 = vadd.f32 %v1968_v17, %v749_v9  ;;  %v623_v12 = vpop.f32.mrb[13].mxu0  ;;  %v751_v13 = vpop.f32.mrb[13].mxu1 }
 0x155   :  { %v624_v14 = vpop.f32.mrb[14].mxu0  ;;  %v752_v15 = vpop.f32.mrb[14].mxu1 }
 0x156   :  { %v625_v16 = vadd.f32 %v1968_v17, %v624_v14  ;;  %v753_v18 = vadd.f32 %v1968_v17, %v752_v15  ;;  %v626_v19 = vpop.f32.mrb[15].mxu0  ;;  %v754_v20 = vpop.f32.mrb[15].mxu1  ;;  %v858_v21 = vmax.f32 %v622_v10, 0.0  ;;  %v890_v22 = vmax.f32 %v750_v11, 0.0 }
 0x158   :  { %v859_v23 = vmax.f32 %v625_v16, 0.0  ;;  %v891_v24 = vmax.f32 %v753_v18, 0.0 }
 0x15a   :  { %v1481_v25 = vpack.c.bf16 %v859_v23, %v858_v21  ;;  %v1561_v26 = vpack.c.bf16 %v891_v24, %v890_v22 }
 0x15b   :  { %v629_v27 = vpop.f32.mrb[16].mxu0  ;;  %v757_v28 = vpop.f32.mrb[16].mxu1 }
 0x15c   :  { %1625 = vst [vmem:[#allocation7 + $0x18] sm:$0xff] %v1481_v25   ;;  %1641 = vst [vmem:[#allocation7 + $0x98] sm:$0xff] %v1561_v26   ;;  %v630_v29 = vadd.f32 %v1968_v17, %v629_v27  ;;  %v758_v30 = vadd.f32 %v1968_v17, %v757_v28  ;;  %v631_v31 = vpop.f32.mrb[17].mxu0  ;;  %v759_v32 = vpop.f32.mrb[17].mxu1 }
 0x15d   :  { %v632_v33 = vpop.f32.mrb[18].mxu0  ;;  %v760_v34 = vpop.f32.mrb[18].mxu1 }
 0x15e   :  { %v633_v35 = vadd.f32 %v1968_v17, %v632_v33  ;;  %v761_v36 = vadd.f32 %v1968_v17, %v760_v34  ;;  %v634_v37 = vpop.f32.mrb[19].mxu0  ;;  %v762_v38 = vpop.f32.mrb[19].mxu1  ;;  %v860_v39 = vmax.f32 %v630_v29, 0.0  ;;  %v892_v40 = vmax.f32 %v758_v30, 0.0 }
 0x160   :  { %v861_v41 = vmax.f32 %v633_v35, 0.0  ;;  %v893_v42 = vmax.f32 %v761_v36, 0.0 }
 0x162   :  { %v1486_v43 = vpack.c.bf16 %v861_v41, %v860_v39  ;;  %v1566_v44 = vpack.c.bf16 %v893_v42, %v892_v40 }
 0x163   :  { %v637_v45 = vpop.f32.mrb[20].mxu0  ;;  %v765_v46 = vpop.f32.mrb[20].mxu1 }
 0x164   :  { %1626 = vst [vmem:[#allocation7 + $0x20] sm:$0xff] %v1486_v43   ;;  %1642 = vst [vmem:[#allocation7 + $0xa0] sm:$0xff] %v1566_v44   ;;  %v638_v47 = vadd.f32 %v1968_v17, %v637_v45  ;;  %v766_v48 = vadd.f32 %v1968_v17, %v765_v46  ;;  %v639_v49 = vpop.f32.mrb[21].mxu0  ;;  %v767_v50 = vpop.f32.mrb[21].mxu1 }
 0x165   :  { %v640_v51 = vpop.f32.mrb[22].mxu0  ;;  %v768_v52 = vpop.f32.mrb[22].mxu1 }
 0x166   :  { %v641_v53 = vadd.f32 %v1968_v17, %v640_v51  ;;  %v769_v54 = vadd.f32 %v1968_v17, %v768_v52  ;;  %v642_v55 = vpop.f32.mrb[23].mxu0  ;;  %v770_v56 = vpop.f32.mrb[23].mxu1  ;;  %v862_v57 = vmax.f32 %v638_v47, 0.0  ;;  %v894_v58 = vmax.f32 %v766_v48, 0.0 }
 0x168   :  { %v863_v59 = vmax.f32 %v641_v53, 0.0  ;;  %v895_v60 = vmax.f32 %v769_v54, 0.0 }
 0x16a   :  { %v1491_v61 = vpack.c.bf16 %v863_v59, %v862_v57  ;;  %v1571_v62 = vpack.c.bf16 %v895_v60, %v894_v58 }
 0x16b   :  { %v645_v63 = vpop.f32.mrb[24].mxu0  ;;  %v773_v0 = vpop.f32.mrb[24].mxu1 }
 0x16c   :  { %1627 = vst [vmem:[#allocation7 + $0x28] sm:$0xff] %v1491_v61   ;;  %1643 = vst [vmem:[#allocation7 + $0xa8] sm:$0xff] %v1571_v62   ;;  %v646_v1 = vadd.f32 %v1968_v17, %v645_v63  ;;  %v774_v2 = vadd.f32 %v1968_v17, %v773_v0  ;;  %v647_v3 = vpop.f32.mrb[25].mxu0  ;;  %v775_v4 = vpop.f32.mrb[25].mxu1 }
 0x16d   :  { %v648_v5 = vpop.f32.mrb[26].mxu0  ;;  %v776_v6 = vpop.f32.mrb[26].mxu1 }
 0x16e   :  { %v649_v7 = vadd.f32 %v1968_v17, %v648_v5  ;;  %v777_v8 = vadd.f32 %v1968_v17, %v776_v6  ;;  %v650_v9 = vpop.f32.mrb[27].mxu0  ;;  %v778_v10 = vpop.f32.mrb[27].mxu1  ;;  %v864_v11 = vmax.f32 %v646_v1, 0.0  ;;  %v896_v12 = vmax.f32 %v774_v2, 0.0 }
 0x170   :  { %v865_v13 = vmax.f32 %v649_v7, 0.0  ;;  %v897_v14 = vmax.f32 %v777_v8, 0.0 }
 0x172   :  { %v1496_v15 = vpack.c.bf16 %v865_v13, %v864_v11  ;;  %v1576_v16 = vpack.c.bf16 %v897_v14, %v896_v12 }
 0x173   :  { %v653_v18 = vpop.f32.mrb[28].mxu0  ;;  %v781_v19 = vpop.f32.mrb[28].mxu1 }
 0x174   :  { %1628 = vst [vmem:[#allocation7 + $0x30] sm:$0xff] %v1496_v15   ;;  %1644 = vst [vmem:[#allocation7 + $0xb0] sm:$0xff] %v1576_v16   ;;  %v654_v20 = vadd.f32 %v1968_v17, %v653_v18  ;;  %v782_v21 = vadd.f32 %v1968_v17, %v781_v19  ;;  %v655_v22 = vpop.f32.mrb[29].mxu0  ;;  %v783_v23 = vpop.f32.mrb[29].mxu1 }
 0x175   :  { %v656_v24 = vpop.f32.mrb[30].mxu0  ;;  %v784_v25 = vpop.f32.mrb[30].mxu1 }
 0x176   :  { %v657_v26 = vadd.f32 %v1968_v17, %v656_v24  ;;  %v785_v27 = vadd.f32 %v1968_v17, %v784_v25  ;;  %v658_v28 = vpop.f32.mrb[31].mxu0  ;;  %v786_v29 = vpop.f32.mrb[31].mxu1  ;;  %v866_v30 = vmax.f32 %v654_v20, 0.0  ;;  %v898_v31 = vmax.f32 %v782_v21, 0.0 }
 0x178   :  { %v867_v32 = vmax.f32 %v657_v26, 0.0  ;;  %v899_v33 = vmax.f32 %v785_v27, 0.0 }
 0x17a   :  { %v1501_v34 = vpack.c.bf16 %v867_v32, %v866_v30  ;;  %v1581_v35 = vpack.c.bf16 %v899_v33, %v898_v31 }
 0x17b   :  { %v661_v36 = vpop.f32.mrb[32].mxu0  ;;  %v789_v37 = vpop.f32.mrb[32].mxu1 }
 0x17c   :  { %1629 = vst [vmem:[#allocation7 + $0x38] sm:$0xff] %v1501_v34   ;;  %1645 = vst [vmem:[#allocation7 + $0xb8] sm:$0xff] %v1581_v35   ;;  %v662_v38 = vadd.f32 %v1968_v17, %v661_v36  ;;  %v790_v39 = vadd.f32 %v1968_v17, %v789_v37  ;;  %v663_v40 = vpop.f32.mrb[33].mxu0  ;;  %v791_v41 = vpop.f32.mrb[33].mxu1 }
 0x17d   :  { %v664_v42 = vpop.f32.mrb[34].mxu0  ;;  %v792_v43 = vpop.f32.mrb[34].mxu1 }
 0x17e   :  { %v665_v44 = vadd.f32 %v1968_v17, %v664_v42  ;;  %v793_v45 = vadd.f32 %v1968_v17, %v792_v43  ;;  %v666_v46 = vpop.f32.mrb[35].mxu0  ;;  %v794_v47 = vpop.f32.mrb[35].mxu1  ;;  %v868_v48 = vmax.f32 %v662_v38, 0.0  ;;  %v900_v49 = vmax.f32 %v790_v39, 0.0 }
 0x180   :  { %v869_v50 = vmax.f32 %v665_v44, 0.0  ;;  %v901_v51 = vmax.f32 %v793_v45, 0.0 }
 0x182   :  { %v1506_v52 = vpack.c.bf16 %v869_v50, %v868_v48  ;;  %v1586_v53 = vpack.c.bf16 %v901_v51, %v900_v49 }
 0x183   :  { %v669_v54 = vpop.f32.mrb[36].mxu0  ;;  %v797_v55 = vpop.f32.mrb[36].mxu1 }
 0x184   :  { %1630 = vst [vmem:[#allocation7 + $0x40] sm:$0xff] %v1506_v52   ;;  %1646 = vst [vmem:[#allocation7 + $0xc0] sm:$0xff] %v1586_v53   ;;  %v670_v56 = vadd.f32 %v1968_v17, %v669_v54  ;;  %v798_v57 = vadd.f32 %v1968_v17, %v797_v55  ;;  %v671_v58 = vpop.f32.mrb[37].mxu0  ;;  %v799_v59 = vpop.f32.mrb[37].mxu1 }
 0x185   :  { %v672_v60 = vpop.f32.mrb[38].mxu0  ;;  %v800_v61 = vpop.f32.mrb[38].mxu1 }
 0x186   :  { %v673_v62 = vadd.f32 %v1968_v17, %v672_v60  ;;  %v801_v63 = vadd.f32 %v1968_v17, %v800_v61  ;;  %v674_v0 = vpop.f32.mrb[39].mxu0  ;;  %v802_v1 = vpop.f32.mrb[39].mxu1  ;;  %v870_v2 = vmax.f32 %v670_v56, 0.0  ;;  %v902_v3 = vmax.f32 %v798_v57, 0.0 }
 0x188   :  { %v871_v4 = vmax.f32 %v673_v62, 0.0  ;;  %v903_v5 = vmax.f32 %v801_v63, 0.0 }
 0x18a   :  { %v1511_v6 = vpack.c.bf16 %v871_v4, %v870_v2  ;;  %v1591_v7 = vpack.c.bf16 %v903_v5, %v902_v3 }
 0x18b   :  { %v677_v8 = vpop.f32.mrb[40].mxu0  ;;  %v805_v9 = vpop.f32.mrb[40].mxu1 }
 0x18c   :  { %1631 = vst [vmem:[#allocation7 + $0x48] sm:$0xff] %v1511_v6   ;;  %1647 = vst [vmem:[#allocation7 + $0xc8] sm:$0xff] %v1591_v7   ;;  %v678_v10 = vadd.f32 %v1968_v17, %v677_v8  ;;  %v806_v11 = vadd.f32 %v1968_v17, %v805_v9  ;;  %v679_v12 = vpop.f32.mrb[41].mxu0  ;;  %v807_v13 = vpop.f32.mrb[41].mxu1 }
 0x18d   :  { %v680_v14 = vpop.f32.mrb[42].mxu0  ;;  %v808_v15 = vpop.f32.mrb[42].mxu1 }
 0x18e   :  { %v681_v16 = vadd.f32 %v1968_v17, %v680_v14  ;;  %v809_v18 = vadd.f32 %v1968_v17, %v808_v15  ;;  %v682_v19 = vpop.f32.mrb[43].mxu0  ;;  %v810_v20 = vpop.f32.mrb[43].mxu1  ;;  %v872_v21 = vmax.f32 %v678_v10, 0.0  ;;  %v904_v22 = vmax.f32 %v806_v11, 0.0 }
 0x190   :  { %v873_v23 = vmax.f32 %v681_v16, 0.0  ;;  %v905_v24 = vmax.f32 %v809_v18, 0.0 }
 0x192   :  { %v1516_v25 = vpack.c.bf16 %v873_v23, %v872_v21  ;;  %v1596_v26 = vpack.c.bf16 %v905_v24, %v904_v22 }
 0x193   :  { %v685_v27 = vpop.f32.mrb[44].mxu0  ;;  %v813_v28 = vpop.f32.mrb[44].mxu1 }
 0x194   :  { %1632 = vst [vmem:[#allocation7 + $0x50] sm:$0xff] %v1516_v25   ;;  %1648 = vst [vmem:[#allocation7 + $0xd0] sm:$0xff] %v1596_v26   ;;  %v686_v29 = vadd.f32 %v1968_v17, %v685_v27  ;;  %v814_v30 = vadd.f32 %v1968_v17, %v813_v28  ;;  %v687_v31 = vpop.f32.mrb[45].mxu0  ;;  %v815_v32 = vpop.f32.mrb[45].mxu1 }
 0x195   :  { %v688_v33 = vpop.f32.mrb[46].mxu0  ;;  %v816_v34 = vpop.f32.mrb[46].mxu1 }
 0x196   :  { %v689_v35 = vadd.f32 %v1968_v17, %v688_v33  ;;  %v817_v36 = vadd.f32 %v1968_v17, %v816_v34  ;;  %v690_v37 = vpop.f32.mrb[47].mxu0  ;;  %v818_v38 = vpop.f32.mrb[47].mxu1  ;;  %v874_v39 = vmax.f32 %v686_v29, 0.0  ;;  %v906_v40 = vmax.f32 %v814_v30, 0.0 }
 0x198   :  { %v875_v41 = vmax.f32 %v689_v35, 0.0  ;;  %v907_v42 = vmax.f32 %v817_v36, 0.0 }
 0x19a   :  { %v1521_v43 = vpack.c.bf16 %v875_v41, %v874_v39  ;;  %v1601_v44 = vpack.c.bf16 %v907_v42, %v906_v40 }
 0x19b   :  { %v693_v45 = vpop.f32.mrb[48].mxu0  ;;  %v821_v46 = vpop.f32.mrb[48].mxu1 }
 0x19c   :  { %1633 = vst [vmem:[#allocation7 + $0x58] sm:$0xff] %v1521_v43   ;;  %1649 = vst [vmem:[#allocation7 + $0xd8] sm:$0xff] %v1601_v44   ;;  %v694_v47 = vadd.f32 %v1968_v17, %v693_v45  ;;  %v822_v48 = vadd.f32 %v1968_v17, %v821_v46  ;;  %v695_v49 = vpop.f32.mrb[49].mxu0  ;;  %v823_v50 = vpop.f32.mrb[49].mxu1 }
 0x19d   :  { %v696_v51 = vpop.f32.mrb[50].mxu0  ;;  %v824_v52 = vpop.f32.mrb[50].mxu1 }
 0x19e   :  { %v697_v53 = vadd.f32 %v1968_v17, %v696_v51  ;;  %v825_v54 = vadd.f32 %v1968_v17, %v824_v52  ;;  %v698_v55 = vpop.f32.mrb[51].mxu0  ;;  %v826_v56 = vpop.f32.mrb[51].mxu1  ;;  %v876_v57 = vmax.f32 %v694_v47, 0.0  ;;  %v908_v58 = vmax.f32 %v822_v48, 0.0 }
 0x1a0   :  { %v877_v59 = vmax.f32 %v697_v53, 0.0  ;;  %v909_v60 = vmax.f32 %v825_v54, 0.0 }
 0x1a2   :  { %v1526_v61 = vpack.c.bf16 %v877_v59, %v876_v57  ;;  %v1606_v62 = vpack.c.bf16 %v909_v60, %v908_v58 }
 0x1a3   :  { %v701_v63 = vpop.f32.mrb[52].mxu0  ;;  %v829_v0 = vpop.f32.mrb[52].mxu1 }
 0x1a4   :  { %1634 = vst [vmem:[#allocation7 + $0x60] sm:$0xff] %v1526_v61   ;;  %1650 = vst [vmem:[#allocation7 + $0xe0] sm:$0xff] %v1606_v62   ;;  %v702_v1 = vadd.f32 %v1968_v17, %v701_v63  ;;  %v830_v2 = vadd.f32 %v1968_v17, %v829_v0  ;;  %v703_v3 = vpop.f32.mrb[53].mxu0  ;;  %v831_v4 = vpop.f32.mrb[53].mxu1 }
 0x1a5   :  { %v704_v5 = vpop.f32.mrb[54].mxu0  ;;  %v832_v6 = vpop.f32.mrb[54].mxu1 }
 0x1a6   :  { %v705_v7 = vadd.f32 %v1968_v17, %v704_v5  ;;  %v833_v8 = vadd.f32 %v1968_v17, %v832_v6  ;;  %v706_v9 = vpop.f32.mrb[55].mxu0  ;;  %v834_v10 = vpop.f32.mrb[55].mxu1  ;;  %v878_v11 = vmax.f32 %v702_v1, 0.0  ;;  %v910_v12 = vmax.f32 %v830_v2, 0.0 }
 0x1a8   :  { %v879_v13 = vmax.f32 %v705_v7, 0.0  ;;  %v911_v14 = vmax.f32 %v833_v8, 0.0 }
 0x1aa   :  { %v1531_v15 = vpack.c.bf16 %v879_v13, %v878_v11  ;;  %v1611_v16 = vpack.c.bf16 %v911_v14, %v910_v12 }
 0x1ab   :  { %v709_v18 = vpop.f32.mrb[56].mxu0  ;;  %v837_v19 = vpop.f32.mrb[56].mxu1 }
 0x1ac   :  { %1635 = vst [vmem:[#allocation7 + $0x68] sm:$0xff] %v1531_v15   ;;  %1651 = vst [vmem:[#allocation7 + $0xe8] sm:$0xff] %v1611_v16   ;;  %v710_v20 = vadd.f32 %v1968_v17, %v709_v18  ;;  %v838_v21 = vadd.f32 %v1968_v17, %v837_v19  ;;  %v711_v22 = vpop.f32.mrb[57].mxu0  ;;  %v839_v23 = vpop.f32.mrb[57].mxu1 }
 0x1ad   :  { %v712_v24 = vpop.f32.mrb[58].mxu0  ;;  %v840_v25 = vpop.f32.mrb[58].mxu1 }
 0x1ae   :  { %v713_v26 = vadd.f32 %v1968_v17, %v712_v24  ;;  %v841_v27 = vadd.f32 %v1968_v17, %v840_v25  ;;  %v714_v28 = vpop.f32.mrb[59].mxu0  ;;  %v842_v29 = vpop.f32.mrb[59].mxu1  ;;  %v880_v30 = vmax.f32 %v710_v20, 0.0  ;;  %v912_v31 = vmax.f32 %v838_v21, 0.0 }
 0x1b0   :  { %v881_v32 = vmax.f32 %v713_v26, 0.0  ;;  %v913_v33 = vmax.f32 %v841_v27, 0.0 }
 0x1b2   :  { %v1536_v34 = vpack.c.bf16 %v881_v32, %v880_v30  ;;  %v1616_v35 = vpack.c.bf16 %v913_v33, %v912_v31 }
 0x1b3   :  { %v717_v36 = vpop.f32.mrb[60].mxu0  ;;  %v845_v37 = vpop.f32.mrb[60].mxu1 }
 0x1b4   :  { %1636 = vst [vmem:[#allocation7 + $0x70] sm:$0xff] %v1536_v34   ;;  %1652 = vst [vmem:[#allocation7 + $0xf0] sm:$0xff] %v1616_v35   ;;  %v718_v38 = vadd.f32 %v1968_v17, %v717_v36  ;;  %v846_v39 = vadd.f32 %v1968_v17, %v845_v37  ;;  %v719_v40 = vpop.f32.mrb[61].mxu0  ;;  %v847_v41 = vpop.f32.mrb[61].mxu1 }
 0x1b5   :  { %v720_v42 = vpop.f32.mrb[62].mxu0  ;;  %v848_v43 = vpop.f32.mrb[62].mxu1 }
 0x1b6   :  { %v721_v44 = vadd.f32 %v1968_v17, %v720_v42  ;;  %v849_v45 = vadd.f32 %v1968_v17, %v848_v43  ;;  %v722_v46 = vpop.f32.mrb[63].mxu0  ;;  %v850_v47 = vpop.f32.mrb[63].mxu1  ;;  %v882_v48 = vmax.f32 %v718_v38, 0.0  ;;  %v914_v49 = vmax.f32 %v846_v39, 0.0 }
 0x1b8   :  { %v883_v50 = vmax.f32 %v721_v44, 0.0  ;;  %v915_v51 = vmax.f32 %v849_v45, 0.0 }
 0x1ba   :  { %v1541_v52 = vpack.c.bf16 %v883_v50, %v882_v48  ;;  %v1621_v53 = vpack.c.bf16 %v915_v51, %v914_v49 }
 0x1bc   :  { %1637 = vst [vmem:[#allocation7 + $0x78] sm:$0xff] %v1541_v52   ;;  %1653 = vst [vmem:[#allocation7 + $0xf8] sm:$0xff] %v1621_v53  }
 0x1bd   :  { %1861 = shalt.err (!%p1858_p6)
}
 0x1be   :  { %s1862_s17 = scalar_lea.hbm %s2052_s3, 4096 }
 0x1bf   :  { %p1863_p7 = scmp.ne.s32.totalorder %s2052_s3, %s1862_s17  ;;  %p1866_p8 = scmp.lt.u32.totalorder %s1862_s17, %s2052_s3 }
 0x1c1   :  { %p1868_p9 = pnand %p1866_p8, %p1863_p7 }
 0x1c3   :  { %1871 = shalt.err (!%p1868_p9)
}
 0x1c4   :  { %1247 = dma.vmem_to_hbm [thread:$0]  %s1242_s13, 4096, %s2052_s3, [#allocation4], %s1882_s0, %s1882_s0, %s1883_s9  }
 0x1c5   :  { %1876 = dma.done.wait [#allocation4], 4096  }
 0x1c6   :  { %1877 = vsyncadd [#allocation4], 4294963200 }
 0x1c7   :  { %1251 = vsyncpa [#allocation3], 1 }
 0x1c8   :  { %1252 = vsyncpa [#allocation6], 1 }
 0x1c9   :  { %1253 = vsyncpa [#allocation4], 1 }

</bundles_post_ra>
